<compile_context>
chip_gen: v7x
topology: tpu7x:2x2x1
jax: 0.10.0
libtpu: 0.0.40
codegen_flags: <defaults>
</compile_context>

<pallas_src>
import jax
import jax.numpy as jnp
from jax.experimental import pallas as pl
from jax.experimental.pallas import tpu as pltpu


_VMEM_BUDGET = 48 * 1024 * 1024  # leave headroom below v7x's 64 MiB physical VMEM


def _round_up(x, m):
    return ((x + m - 1) // m) * m


def _autoencoder_kernel(x_ref, wg_ref, bg_ref, wh_ref, bh_ref, o_ref):
    # x_ref:  (bm, nq_p)   matmul dtype (bf16 or f32), streamed per grid step
    # wg_ref: (nq_p, k_p)  matmul dtype, Wg^T, resident across grid
    # bg_ref: (1, k_p)     f32, resident
    # wh_ref: (k_p, nq_p)  matmul dtype, Wh^T, resident across grid
    # bh_ref: (1, nq_p)    f32, resident
    # o_ref:  (bm, nq_p)   output dtype
    hidden = jax.nn.sigmoid(
        jnp.dot(x_ref[...], wg_ref[...], preferred_element_type=jnp.float32)
        + bg_ref[...]
    )
    out = jax.nn.sigmoid(
        jnp.dot(hidden.astype(wh_ref.dtype), wh_ref[...],
                preferred_element_type=jnp.float32)
        + bh_ref[...]
    )
    o_ref[...] = out.astype(o_ref.dtype)


def _pick_bm(batch, nq_p, in_itemsize, out_itemsize, weights_bytes):
    """Pick a batch tile: single step for small B; 256/512-row tiles otherwise
    (>=2 'parallel' steps so both v7x TensorCores get work), capped by VMEM."""
    if batch <= 256:
        bm = _round_up(batch, 8)
    elif batch <= 1024:
        bm = 256
    else:
        bm = 512

    def footprint(b):
        # double-buffered x tile + out tile, plus resident weights/biases
        return weights_bytes + 2 * b * nq_p * (in_itemsize + out_itemsize)

    while bm > 8 and footprint(bm) > _VMEM_BUDGET:
        bm = _round_up(bm // 2, 8)
    return max(bm, 8)


def autoencoder_forward(x, g_weight, g_bias, h_weight, h_bias, *,
                        bm=None, matmul_dtype=jnp.bfloat16):
    """Forward pass of AutoEncoder: sigmoid(h(sigmoid(g(x)))).

    x:        (B, num_question)
    g_weight: (k, num_question)   -- PyTorch nn.Linear layout (out, in)
    g_bias:   (k,)
    h_weight: (num_question, k)
    h_bias:   (num_question,)
    """
    B, nq = x.shape
    k = g_weight.shape[0]
    assert g_weight.shape == (k, nq) and h_weight.shape == (nq, k)
    assert g_bias.shape == (k,) and h_bias.shape == (nq,)

    out_dtype = x.dtype
    nq_p = _round_up(nq, 128)   # lane-dense last dims
    k_p = _round_up(k, 128)

    in_itemsize = jnp.dtype(matmul_dtype).itemsize
    weights_bytes = 2 * nq_p * k_p * in_itemsize + (k_p + nq_p) * 4
    if bm is None:
        bm = _pick_bm(B, nq_p, in_itemsize, jnp.dtype(out_dtype).itemsize,
                      weights_bytes)
    B_p = _round_up(B, bm)

    # Glue: pre-transpose weights to (in, out), zero-pad to aligned shapes,
    # cast matmul operands (padding is exact, see header comment).
    xp = jnp.zeros((B_p, nq_p), matmul_dtype).at[:B, :nq].set(
        x.astype(matmul_dtype))
    wg_t = jnp.zeros((nq_p, k_p), matmul_dtype).at[:nq, :k].set(
        g_weight.T.astype(matmul_dtype))
    wh_t = jnp.zeros((k_p, nq_p), matmul_dtype).at[:k, :nq].set(
        h_weight.T.astype(matmul_dtype))
    bg = jnp.zeros((1, k_p), jnp.float32).at[0, :k].set(
        g_bias.astype(jnp.float32))
    bh = jnp.zeros((1, nq_p), jnp.float32).at[0, :nq].set(
        h_bias.astype(jnp.float32))

    grid = (B_p // bm,)
    out = pl.pallas_call(
        _autoencoder_kernel,
        out_shape=jax.ShapeDtypeStruct((B_p, nq_p), out_dtype),
        grid=grid,
        in_specs=[
            pl.BlockSpec((bm, nq_p), lambda i: (i, 0)),    # x tile (streamed)
            pl.BlockSpec((nq_p, k_p), lambda i: (0, 0)),   # Wg^T (resident)
            pl.BlockSpec((1, k_p), lambda i: (0, 0)),      # bg   (resident)
            pl.BlockSpec((k_p, nq_p), lambda i: (0, 0)),   # Wh^T (resident)
            pl.BlockSpec((1, nq_p), lambda i: (0, 0)),     # bh   (resident)
        ],
        out_specs=pl.BlockSpec((bm, nq_p), lambda i: (i, 0)),
        compiler_params=pltpu.CompilerParams(
            dimension_semantics=("parallel",),
            vmem_limit_bytes=_VMEM_BUDGET,
        ),
    )(xp, wg_t, bg, wh_t, bh)
    return out[:B, :nq]


def _reference_forward(x, g_weight, g_bias, h_weight, h_bias):
    hidden = jax.nn.sigmoid(x @ g_weight.T + g_bias)
    return jax.nn.sigmoid(hidden @ h_weight.T + h_bias)


if __name__ == "__main__":
    # Small shapes consistent with the module defaults: k=100 (module default),
    # num_question=200, batch=16 -- deliberately NOT multiples of 128 so the
    # padding paths are exercised.
    B, num_question, k = 16, 200, 100

    key = jax.random.PRNGKey(0)
    kx, kgw, kgb, khw, khb = jax.random.split(key, 5)

    # Deterministic parameter init (mimicking nn.Linear uniform(-1/sqrt(fan_in), ...)).
    bound_g = 1.0 / jnp.sqrt(num_question)
    bound_h = 1.0 / jnp.sqrt(k)
    g_weight = jax.random.uniform(kgw, (k, num_question), jnp.float32,
                                  -bound_g, bound_g)
    g_bias = jax.random.uniform(kgb, (k,), jnp.float32, -bound_g, bound_g)
    h_weight = jax.random.uniform(khw, (num_question, k), jnp.float32,
                                  -bound_h, bound_h)
    h_bias = jax.random.uniform(khb, (num_question,), jnp.float32,
                                -bound_h, bound_h)

    # Input "user vectors" in [0, 1] (e.g. imputed correctness matrix rows).
    x = jax.random.uniform(kx, (B, num_question), jnp.float32)

    ref = _reference_forward(x, g_weight, g_bias, h_weight, h_bias)

    # f32-operand path: matches the reference tightly.
    out_f32 = jax.block_until_ready(
        autoencoder_forward(x, g_weight, g_bias, h_weight, h_bias,
                            matmul_dtype=jnp.float32))
    assert out_f32.shape == (B, num_question)
    assert jnp.allclose(out_f32, ref, atol=1e-5, rtol=1e-5)

    # bf16-operand path (default, ~2x less HBM traffic, f32 accumulation):
    # looser tolerance for the bf16 operand rounding.
    out_bf16 = jax.block_until_ready(
        autoencoder_forward(x, g_weight, g_bias, h_weight, h_bias))
    assert out_bf16.shape == (B, num_question)
    assert jnp.allclose(out_bf16, ref, atol=2e-2, rtol=2e-2)

    print("KERNEL_OK")
</pallas_src>

<mosaic_0001>
module attributes {stable_mosaic.version = 11 : i64} {
  func.func @_autoencoder_kernel(%arg0: i32, %arg1: memref<16x256xf32, #tpu.memory_space<vmem>>, %arg2: memref<256x128xf32, #tpu.memory_space<vmem>>, %arg3: memref<1x128xf32, #tpu.memory_space<vmem>>, %arg4: memref<128x256xf32, #tpu.memory_space<vmem>>, %arg5: memref<1x256xf32, #tpu.memory_space<vmem>>, %arg6: memref<16x256xf32, #tpu.memory_space<vmem>>) attributes {dimension_semantics = [#tpu.dimension_semantics<parallel>], iteration_bounds = array<i64: 1>, scalar_prefetch = 0 : i64, scratch_operands = 0 : i64, tpu.core_type = #tpu.core_type<tc>, window_params = [{transform_indices = @transform_0, window_bounds = array<i64: 16, 256>}, {pipeline_mode = #tpu.pipeline_mode<synchronous>, transform_indices = @transform_1, window_bounds = array<i64: 256, 128>}, {pipeline_mode = #tpu.pipeline_mode<synchronous>, transform_indices = @transform_2, window_bounds = array<i64: 1, 128>}, {pipeline_mode = #tpu.pipeline_mode<synchronous>, transform_indices = @transform_3, window_bounds = array<i64: 128, 256>}, {pipeline_mode = #tpu.pipeline_mode<synchronous>, transform_indices = @transform_4, window_bounds = array<i64: 1, 256>}, {transform_indices = @transform_5, window_bounds = array<i64: 16, 256>}]} {
    %c0 = arith.constant 0 : index
    %c0_0 = arith.constant 0 : index
    %0 = vector.load %arg1[%c0, %c0_0] : memref<16x256xf32, #tpu.memory_space<vmem>>, vector<16x256xf32>
    %c0_1 = arith.constant 0 : index
    %c0_2 = arith.constant 0 : index
    %1 = vector.load %arg2[%c0_1, %c0_2] : memref<256x128xf32, #tpu.memory_space<vmem>>, vector<256x128xf32>
    %cst = arith.constant dense<0.000000e+00> : vector<16x128xf32>
    %2 = tpu.matmul %0, %1, %cst {dimension_numbers = #tpu.dot_dimension_numbers<[1], [0], [0], [1], [0, 0, 1, 1], [], []>} : vector<16x256xf32>, vector<256x128xf32>, vector<16x128xf32> -> vector<16x128xf32>
    %c0_3 = arith.constant 0 : index
    %c0_4 = arith.constant 0 : index
    %3 = vector.load %arg3[%c0_3, %c0_4] : memref<1x128xf32, #tpu.memory_space<vmem>>, vector<1x128xf32>
    %4 = vector.broadcast %3 : vector<1x128xf32> to vector<16x128xf32>
    %5 = arith.addf %2, %4 : vector<16x128xf32>
    %6 = arith.negf %5 : vector<16x128xf32>
    %7 = math.exp %6 : vector<16x128xf32>
    %cst_5 = arith.constant 1.000000e+00 : f32
    %8 = vector.broadcast %cst_5 : f32 to vector<16x128xf32>
    %9 = arith.addf %8, %7 : vector<16x128xf32>
    %10 = arith.divf %8, %9 : vector<16x128xf32>
    %c0_6 = arith.constant 0 : index
    %c0_7 = arith.constant 0 : index
    %11 = vector.load %arg4[%c0_6, %c0_7] : memref<128x256xf32, #tpu.memory_space<vmem>>, vector<128x256xf32>
    %cst_8 = arith.constant dense<0.000000e+00> : vector<16x256xf32>
    %12 = tpu.matmul %10, %11, %cst_8 {dimension_numbers = #tpu.dot_dimension_numbers<[1], [0], [0], [1], [0, 0, 1, 1], [], []>} : vector<16x128xf32>, vector<128x256xf32>, vector<16x256xf32> -> vector<16x256xf32>
    %c0_9 = arith.constant 0 : index
    %c0_10 = arith.constant 0 : index
    %13 = vector.load %arg5[%c0_9, %c0_10] : memref<1x256xf32, #tpu.memory_space<vmem>>, vector<1x256xf32>
    %14 = vector.broadcast %13 : vector<1x256xf32> to vector<16x256xf32>
    %15 = arith.addf %12, %14 : vector<16x256xf32>
    %16 = arith.negf %15 : vector<16x256xf32>
    %17 = math.exp %16 : vector<16x256xf32>
    %cst_11 = arith.constant 1.000000e+00 : f32
    %18 = vector.broadcast %cst_11 : f32 to vector<16x256xf32>
    %19 = arith.addf %18, %17 : vector<16x256xf32>
    %20 = arith.divf %18, %19 : vector<16x256xf32>
    %c0_12 = arith.constant 0 : index
    %c0_13 = arith.constant 0 : index
    %21 = vector.load %arg6[%c0_12, %c0_13] : memref<16x256xf32, #tpu.memory_space<vmem>>, vector<16x256xf32>
    tpu.vector_store %arg6[%c0_12, %c0_13], %20 {strides = array<i32>} : memref<16x256xf32, #tpu.memory_space<vmem>>, vector<16x256xf32>,
    return
  }
  func.func @transform_0(%arg0: i32) -> (i32, i32) {
    %c0_i32 = arith.constant 0 : i32
    %c0_i32_0 = arith.constant 0 : i32
    return %arg0, %c0_i32 : i32, i32
  }
  func.func @transform_1(%arg0: i32) -> (i32, i32) {
    %c0_i32 = arith.constant 0 : i32
    %c0_i32_0 = arith.constant 0 : i32
    %c0_i32_1 = arith.constant 0 : i32
    return %c0_i32, %c0_i32_0 : i32, i32
  }
  func.func @transform_2(%arg0: i32) -> (i32, i32) {
    %c0_i32 = arith.constant 0 : i32
    %c0_i32_0 = arith.constant 0 : i32
    %c0_i32_1 = arith.constant 0 : i32
    return %c0_i32, %c0_i32_0 : i32, i32
  }
  func.func @transform_3(%arg0: i32) -> (i32, i32) {
    %c0_i32 = arith.constant 0 : i32
    %c0_i32_0 = arith.constant 0 : i32
    %c0_i32_1 = arith.constant 0 : i32
    return %c0_i32, %c0_i32_0 : i32, i32
  }
  func.func @transform_4(%arg0: i32) -> (i32, i32) {
    %c0_i32 = arith.constant 0 : i32
    %c0_i32_0 = arith.constant 0 : i32
    %c0_i32_1 = arith.constant 0 : i32
    return %c0_i32, %c0_i32_0 : i32, i32
  }
  func.func @transform_5(%arg0: i32) -> (i32, i32) {
    %c0_i32 = arith.constant 0 : i32
    %c0_i32_0 = arith.constant 0 : i32
    return %arg0, %c0_i32 : i32, i32
  }
}

</mosaic_0001>

<bundles_post_ra>
// kernel: tpu_custom_call.1
= control target key start
LH: loop header
LB: loop body
LE: loop exit
PB: predicated region body
PF: predicated region fallthrough
CT: control target
= control target key end

     0   :  { %10 = vsyncpa [#allocation3], 0  ;;  %s697_s0 = inlined_call_operand.hbm [shape: f32[16,256], index: 0, kind: input, shape index: {}]   ;;  %s698_s1 = inlined_call_operand.hbm [shape: f32[256,128], index: 1, kind: input, shape index: {}]   ;;  %s699_s2 = inlined_call_operand.vmem [shape: f32[1,128], index: 2, kind: input, shape index: {}]   ;;  %s700_s3 = inlined_call_operand.hbm [shape: f32[128,256], index: 3, kind: input, shape index: {}]   ;;  %s701_s4 = inlined_call_operand.vmem [shape: f32[1,256], index: 4, kind: input, shape index: {}]   ;;  %s702_s5 = inlined_call_operand.hbm [shape: f32[16,256], index: 5, kind: output, shape index: {}]  }
   0x1   :  { %11 = vsyncpa [#allocation6], 0 }
   0x2   :  { %12 = vsyncpa [#allocation4], 0  ;;  %s595_s18 = smov [#allocation5]   ;;  %s501_s22 = scalar_lea.hbm %s698_s1, 4096 }
   0x3   :  { %s30_s19 = sshll.u32 %s595_s18, 4  ;;  %p502_p0 = scmp.ne.s32.totalorder %s698_s1, %s501_s22  ;;  %s31_s19 = int_to_ptr.vmem [resolvable:$true] %s30_s19 }
   0x4   :  { %p505_p1 = scmp.lt.u32.totalorder %s501_s22, %s698_s1 }
   0x6   :  { %p507_p2 = pnand %p505_p1, %p502_p0 }
   0x8   :  { %510 = shalt.err (!%p507_p2)
}
   0x9   :  { %s511_s27 = scalar_lea.vmem %s31_s19, 4096  ;;  %p516_p4 = scmp.lt.s32.totalorder %s31_s19, %s31_s19 }
   0xa   :  { %p512_p3 = scmp.ne.s32.totalorder %s31_s19, %s511_s27  ;;  %p517_p5 = scmp.lt.s32.totalorder %s511_s27, %s511_s27 }
   0xc   :  { %p518_p6 = por %p517_p5, %p516_p4 }
   0xe   :  { %p519_p7 = pnand %p518_p6, %p512_p3 }
  0x10   :  { %522 = shalt.err (!%p519_p7)
}
  0x11   :  { %s596_s28 = smov 128   ;;  %s597_s29 = smov 8  }
  0x12   :  { %36 = dma.hbm_to_vmem [thread:$0]  %s698_s1, 4096, %s31_s19, [#allocation6], %s596_s28, %s596_s28, %s597_s29  }
  0x13   :  { %s598_s7 = smov [#allocation2]   ;;  %s523_s11 = scalar_lea.hbm %s697_s0, 512 }
  0x14   :  { %s18_s8 = sshll.u32 %s598_s7, 4  ;;  %p524_p8 = scmp.ne.s32.totalorder %s697_s0, %s523_s11  ;;  %s19_s8 = int_to_ptr.vmem [resolvable:$true] %s18_s8 }
  0x15   :  { %p527_p9 = scmp.lt.u32.totalorder %s523_s11, %s697_s0 }
  0x17   :  { %p529_p10 = pnand %p527_p9, %p524_p8 }
  0x19   :  { %532 = shalt.err (!%p529_p10)
}
  0x1a   :  { %s533_s16 = scalar_lea.vmem %s19_s8, 512  ;;  %p538_p12 = scmp.lt.s32.totalorder %s19_s8, %s19_s8 }
  0x1b   :  { %p534_p11 = scmp.ne.s32.totalorder %s19_s8, %s533_s16  ;;  %p539_p13 = scmp.lt.s32.totalorder %s533_s16, %s533_s16 }
  0x1d   :  { %p540_p0 = por %p539_p13, %p538_p12 }
  0x1f   :  { %p541_p1 = pnand %p540_p0, %p534_p11 }
  0x21   :  { %544 = shalt.err (!%p541_p1)
}
  0x22   :  { %s599_s1 = smov 256   ;;  %s600_s17 = smov 16  }
  0x23   :  { %24 = dma.hbm_to_vmem [thread:$0]  %s697_s0, 512, %s19_s8, [#allocation3], %s599_s1, %s599_s1, %s600_s17  }
  0x24   :  { %s601_s20 = smov [#allocation7]   ;;  %s545_s24 = scalar_lea.hbm %s700_s3, 4096 }
  0x25   :  { %s44_s21 = sshll.u32 %s601_s20, 4  ;;  %p546_p2 = scmp.ne.s32.totalorder %s700_s3, %s545_s24  ;;  %s45_s21 = int_to_ptr.vmem [resolvable:$true] %s44_s21 }
  0x26   :  { %p549_p3 = scmp.lt.u32.totalorder %s545_s24, %s700_s3 }
  0x28   :  { %p551_p4 = pnand %p549_p3, %p546_p2 }
  0x2a   :  { %554 = shalt.err (!%p551_p4)
}
  0x2b   :  { %s555_s29 = scalar_lea.vmem %s45_s21, 4096  ;;  %p560_p6 = scmp.lt.s32.totalorder %s45_s21, %s45_s21 }
  0x2c   :  { %p556_p5 = scmp.ne.s32.totalorder %s45_s21, %s555_s29  ;;  %p561_p7 = scmp.lt.s32.totalorder %s555_s29, %s555_s29 }
  0x2e   :  { %p562_p8 = por %p561_p7, %p560_p6 }
  0x30   :  { %p563_p9 = pnand %p562_p8, %p556_p5 }
  0x32   :  { %566 = shalt.err (!%p563_p9)
}
  0x33   :  { %50 = dma.hbm_to_vmem [thread:$0]  %s700_s3, 4096, %s45_s21, [#allocation6], %s599_s1, %s599_s1, %s600_s17  }
  0x34   :  { %589 = dma.done.wait [#allocation3], 512  }
  0x35   :  { %590 = vsyncadd [#allocation3], 4294966784 }
  0x36   :  { %591 = dma.done.wait [#allocation6], 8192  }
  0x37   :  { %592 = vsyncadd [#allocation6], 4294959104  ;;  %v82_v0 = vld [vmem:[#allocation5 + $0x80] sm:$0xff]  ;;  %v83_v1 = vld [vmem:[#allocation5 + $0x88] sm:$0xff] }
  0x38   :  { %v66_v2 = vld [vmem:[#allocation5] sm:$0xff]  ;;  %v404_v3 = vpack.c.bf16 %v83_v1, %v82_v0  ;;  %v67_v4 = vld [vmem:[#allocation5 + $0x8] sm:$0xff]  ;;  %v84_v5 = vld [vmem:[#allocation5 + $0x90] sm:$0xff] }
  0x39   :  { %v85_v6 = vld [vmem:[#allocation5 + $0x98] sm:$0xff]  ;;  %v406_v7 = vpack.c.bf16 %v67_v4, %v66_v2  ;;  %v68_v9 = vld [vmem:[#allocation5 + $0x10] sm:$0xff]  ;;  %v86_v11 = vld [vmem:[#allocation5 + $0xa0] sm:$0xff] }
  0x3a   :  { %v408_v8 = vpack.c.bf16 %v85_v6, %v84_v5  ;;  %v69_v10 = vld [vmem:[#allocation5 + $0x18] sm:$0xff]  ;;  %405 = vmatprep.subr.bf16.mxu0 %v404_v3  ;;  %v87_v12 = vld [vmem:[#allocation5 + $0xa8] sm:$0xff]  ;;  %v70_v15 = vld [vmem:[#allocation5 + $0x20] sm:$0xff] }
  0x3b   :  { %407 = vmatpush3.bf16.msra.mxu0 %v406_v7  ;;  %v410_v13 = vpack.c.bf16 %v69_v10, %v68_v9  ;;  %v412_v14 = vpack.c.bf16 %v87_v12, %v86_v11  ;;  %v71_v16 = vld [vmem:[#allocation5 + $0x28] sm:$0xff]  ;;  %v88_v17 = vld [vmem:[#allocation5 + $0xb0] sm:$0xff]  ;;  %v89_v18 = vld [vmem:[#allocation5 + $0xb8] sm:$0xff] }
  0x3c   :  { %409 = vmatprep.subr.bf16.mxu0 %v408_v8  ;;  %v414_v19 = vpack.c.bf16 %v71_v16, %v70_v15  ;;  %v416_v20 = vpack.c.bf16 %v89_v18, %v88_v17  ;;  %v72_v21 = vld [vmem:[#allocation5 + $0x30] sm:$0xff]  ;;  %v73_v22 = vld [vmem:[#allocation5 + $0x38] sm:$0xff]  ;;  %v90_v23 = vld [vmem:[#allocation5 + $0xc0] sm:$0xff] }
  0x3d   :  { %v91_v24 = vld [vmem:[#allocation5 + $0xc8] sm:$0xff]  ;;  %v418_v26 = vpack.c.bf16 %v73_v22, %v72_v21  ;;  %v74_v28 = vld [vmem:[#allocation5 + $0x40] sm:$0xff]  ;;  %v92_v30 = vld [vmem:[#allocation5 + $0xd0] sm:$0xff] }
  0x3e   :  { %v63_v25 = vld [vmem:[#allocation2 + $0x8] sm:$0xff]  ;;  %v420_v27 = vpack.c.bf16 %v91_v24, %v90_v23  ;;  %v93_v31 = vld [vmem:[#allocation5 + $0xd8] sm:$0xff]  ;;  %v76_v34 = vld [vmem:[#allocation5 + $0x50] sm:$0xff] }
  0x3f   :  { %411 = vmatpush3.bf16.msra.mxu0 %v410_v13  ;;  %169 = vmatprep.mubr.f32.mxu0 %v63_v25  ;;  %v75_v29 = vld [vmem:[#allocation5 + $0x48] sm:$0xff]  ;;  %v424_v33 = vpack.c.bf16 %v93_v31, %v92_v30  ;;  %v77_v35 = vld [vmem:[#allocation5 + $0x58] sm:$0xff]  ;;  %v94_v36 = vld [vmem:[#allocation5 + $0xe0] sm:$0xff] }
  0x40   :  { %413 = vmatprep.subr.bf16.mxu0 %v412_v14  ;;  %v422_v32 = vpack.c.bf16 %v75_v29, %v74_v28  ;;  %v95_v37 = vld [vmem:[#allocation5 + $0xe8] sm:$0xff]  ;;  %v426_v38 = vpack.c.bf16 %v77_v35, %v76_v34  ;;  %v78_v40 = vld [vmem:[#allocation5 + $0x60] sm:$0xff]  ;;  %v96_v42 = vld [vmem:[#allocation5 + $0xf0] sm:$0xff]  ;;  %v602_v35 = vmov 0.0  }
  0x41   :  { %v428_v39 = vpack.c.bf16 %v95_v37, %v94_v36  ;;  %v79_v41 = vld [vmem:[#allocation5 + $0x68] sm:$0xff]  ;;  %v97_v43 = vld [vmem:[#allocation5 + $0xf8] sm:$0xff]  ;;  %v80_v46 = vld [vmem:[#allocation5 + $0x70] sm:$0xff]  ;;  %300 = vmatprep.mubr.f32.mxu1 %v602_v35 }
  0x42   :  { %v430_v44 = vpack.c.bf16 %v79_v41, %v78_v40  ;;  %v432_v45 = vpack.c.bf16 %v97_v43, %v96_v42  ;;  %v81_v47 = vld [vmem:[#allocation5 + $0x78] sm:$0xff]  ;;  %v62_v49 = vld [vmem:[#allocation2] sm:$0xff]  ;;  %v64_v51 = vld [vmem:[#allocation2 + $0x10] sm:$0xff] }
  0x43   :  { %415 = vmatpush3.bf16.msra.mxu0 %v414_v19  ;;  %v434_v48 = vpack.c.bf16 %v81_v47, %v80_v46  ;;  %v65_v50 = vld [vmem:[#allocation2 + $0x18] sm:$0xff]  ;;  %v193_v52 = vld [vmem:[#allocation7 + $0x8] sm:$0xff]  ;;  %v192_v55 = vld [vmem:[#allocation7] sm:$0xff] }
  0x44   :  { %417 = vmatprep.subr.bf16.mxu0 %v416_v20  ;;  %v195_v53 = vld [vmem:[#allocation7 + $0x18] sm:$0xff]  ;;  %v194_v56 = vld [vmem:[#allocation7 + $0x10] sm:$0xff]  ;;  %v197_v58 = vld [vmem:[#allocation7 + $0x28] sm:$0xff] }
  0x45   :  { %v436_v54 = vpack.c.bf16 %v195_v53, %v193_v52  ;;  %v438_v57 = vpack.c.bf16 %v194_v56, %v192_v55  ;;  %v199_v59 = vld [vmem:[#allocation7 + $0x38] sm:$0xff]  ;;  %v196_v61 = vld [vmem:[#allocation7 + $0x20] sm:$0xff]  ;;  %v198_v62 = vld [vmem:[#allocation7 + $0x30] sm:$0xff] }
  0x46   :  { %v440_v60 = vpack.c.bf16 %v199_v59, %v197_v58  ;;  %v442_v63 = vpack.c.bf16 %v198_v62, %v196_v61  ;;  %v201_v0 = vld [vmem:[#allocation7 + $0x48] sm:$0xff]  ;;  %v203_v1 = vld [vmem:[#allocation7 + $0x58] sm:$0xff]  ;;  %v200_v3 = vld [vmem:[#allocation7 + $0x40] sm:$0xff] }
  0x47   :  { %419 = vmatpush3.bf16.msra.mxu0 %v418_v26  ;;  %437 = vmatprep.subr.bf16.mxu1 %v436_v54  ;;  %v444_v2 = vpack.c.bf16 %v203_v1, %v201_v0  ;;  %v202_v4 = vld [vmem:[#allocation7 + $0x50] sm:$0xff]  ;;  %v205_v6 = vld [vmem:[#allocation7 + $0x68] sm:$0xff]  ;;  %v207_v7 = vld [vmem:[#allocation7 + $0x78] sm:$0xff]  ;;  %v226_v54 = vlaneseq }
  0x48   :  { %421 = vmatprep.subr.bf16.mxu0 %v420_v27  ;;  %439 = vmatpush1.bf16.msra.mxu1 %v438_v57  ;;  %v446_v5 = vpack.c.bf16 %v202_v4, %v200_v3  ;;  %v448_v8 = vpack.c.bf16 %v207_v7, %v205_v6  ;;  %v204_v9 = vld [vmem:[#allocation7 + $0x60] sm:$0xff]  ;;  %v206_v10 = vld [vmem:[#allocation7 + $0x70] sm:$0xff]  ;;  %v209_v12 = vld [vmem:[#allocation7 + $0x88] sm:$0xff] }
  0x49   :  { %441 = vmatprep.subr.bf16.mxu1 %v440_v60  ;;  %v450_v11 = vpack.c.bf16 %v206_v10, %v204_v9  ;;  %v211_v13 = vld [vmem:[#allocation7 + $0x98] sm:$0xff]  ;;  %v208_v15 = vld [vmem:[#allocation7 + $0x80] sm:$0xff]  ;;  %v210_v16 = vld [vmem:[#allocation7 + $0x90] sm:$0xff]  ;;  %v227_v55 = vshrl.u32 %v226_v54, 7 }
  0x4a   :  { %v452_v14 = vpack.c.bf16 %v211_v13, %v209_v12  ;;  %v454_v17 = vpack.c.bf16 %v210_v16, %v208_v15  ;;  %v213_v18 = vld [vmem:[#allocation7 + $0xa8] sm:$0xff]  ;;  %v215_v19 = vld [vmem:[#allocation7 + $0xb8] sm:$0xff]  ;;  %v212_v21 = vld [vmem:[#allocation7 + $0xa0] sm:$0xff] }
  0x4b   :  { %423 = vmatpush3.bf16.msra.mxu0 %v422_v32  ;;  %v456_v20 = vpack.c.bf16 %v215_v19, %v213_v18  ;;  %v214_v22 = vld [vmem:[#allocation7 + $0xb0] sm:$0xff]  ;;  %v217_v24 = vld [vmem:[#allocation7 + $0xc8] sm:$0xff]  ;;  %v219_v25 = vld [vmem:[#allocation7 + $0xd8] sm:$0xff]  ;;  %v228_v56 = vsub.s32 0, %v227_v55  ;;  %v232_v58 = vsub.s32 1, %v227_v55 }
  0x4c   :  { %425 = vmatprep.subr.bf16.mxu0 %v424_v33  ;;  %443 = vmatpush1.bf16.msra.mxu1 %v442_v63  ;;  %v458_v23 = vpack.c.bf16 %v214_v22, %v212_v21  ;;  %v460_v26 = vpack.c.bf16 %v219_v25, %v217_v24  ;;  %v216_v27 = vld [vmem:[#allocation7 + $0xc0] sm:$0xff]  ;;  %v218_v28 = vld [vmem:[#allocation7 + $0xd0] sm:$0xff]  ;;  %v221_v30 = vld [vmem:[#allocation7 + $0xe8] sm:$0xff] }
  0x4d   :  { %445 = vmatprep.subr.bf16.mxu1 %v444_v2  ;;  %v462_v29 = vpack.c.bf16 %v218_v28, %v216_v27  ;;  %v223_v31 = vld [vmem:[#allocation7 + $0xf8] sm:$0xff]  ;;  %v220_v32 = vld [vmem:[#allocation7 + $0xe0] sm:$0xff]  ;;  %v222_v34 = vld [vmem:[#allocation7 + $0xf0] sm:$0xff] }
  0x4e   :  { %v464_v33 = vpack.c.bf16 %v223_v31, %v221_v30  ;;  %v466_v36 = vpack.c.bf16 %v222_v34, %v220_v32  ;;  %v224_v57 = vld [vmem:[%s701_s4] sm:$0x3]  ;;  %s603_s4 = smov [#allocation8]  }
  0x4f   :  { %427 = vmatpush3.bf16.msra.mxu0 %v426_v38  ;;  %v359_v38 = vld [vmem:[%s699_s2] ss:$0 sm:$0xff]  ;;  %v229_v59 = vrot.slane %v224_v57, %v228_v56  ;;  %v233_v60 = vrot.slane %v224_v57, %v232_v58  ;;  %s346_s8 = sshll.u32 %s603_s4, 4  ;;  %s347_s8 = int_to_ptr.vmem [resolvable:$true] %s346_s8 }
  0x50   :  { %429 = vmatprep.subr.bf16.mxu0 %v428_v39  ;;  %447 = vmatpush1.bf16.msra.mxu1 %v446_v5  ;;  %s567_s9 = scalar_lea.vmem %s347_s8, 512  ;;  %p572_p11 = scmp.lt.s32.totalorder %s347_s8, %s347_s8 }
  0x51   :  { %449 = vmatprep.subr.bf16.mxu1 %v448_v8  ;;  %p568_p10 = scmp.ne.s32.totalorder %s347_s8, %s567_s9  ;;  %p573_p12 = scmp.lt.s32.totalorder %s567_s9, %s567_s9 }
  0x53   :  { %431 = vmatpush3.bf16.msra.mxu0 %v430_v44  ;;  %p574_p13 = por %p573_p12, %p572_p11 }
  0x54   :  { %433 = vmatprep.subr.bf16.mxu0 %v432_v45  ;;  %451 = vmatpush1.bf16.msra.mxu1 %v450_v11 }
  0x55   :  { %453 = vmatprep.subr.bf16.mxu1 %v452_v14  ;;  %p575_p0 = pnand %p574_p13, %p568_p10 }
  0x57   :  { %435 = vmatpush3.bf16.msra.mxu0 %v434_v48 }
  0x58   :  { %455 = vmatpush1.bf16.msra.mxu1 %v454_v17 }
  0x59   :  { %457 = vmatprep.subr.bf16.mxu1 %v456_v20 }
  0x5a   :  { %170 = vmatmul.mubr.f32.vlgmr.msra.gmra.mrb[0].mxu0 %v62_v49 }
  0x5b   :  { %174 = vmatprep.mubr.f32.mxu0 %v65_v50 }
  0x5c   :  { %459 = vmatpush1.bf16.msra.mxu1 %v458_v23 }
  0x5d   :  { %461 = vmatprep.subr.bf16.mxu1 %v460_v26 }
  0x5e   :  { %175 = vmatmul.mubr.f32.gmra.mrb[2].mxu0 %v64_v51 }
  0x60   :  { %463 = vmatpush1.bf16.msra.mxu1 %v462_v29 }
  0x61   :  { %465 = vmatprep.subr.bf16.mxu1 %v464_v33 }
  0x64   :  { %467 = vmatpush1.bf16.msra.mxu1 %v466_v36 }
 0x12d   :  { %v398_v37 = vpop.f32.mrb[0].mxu0 }
 0x12e   :  { %v399_v39 = vpop.f32.mrb[1].mxu0 }
 0x12f   :  { %v400_v40 = vadd.f32 %v399_v39, %v398_v37 }
 0x131   :  { %v172_v41 = vadd.f32 %v400_v40, %v359_v38  ;;  %v401_v42 = vpop.f32.mrb[2].mxu0 }
 0x132   :  { %v402_v43 = vpop.f32.mrb[3].mxu0 }
 0x133   :  { %v360_v44 = vmul.f32 -1.442695, %v172_v41  ;;  %v403_v45 = vadd.f32 %v402_v43, %v401_v42 }
 0x135   :  { %477 = vpow2.f32 %v360_v44  ;;  %v177_v46 = vadd.f32 %v403_v45, %v359_v38 }
 0x137   :  { %v361_v47 = vmul.f32 -1.442695, %v177_v46 }
 0x139   :  { %479 = vpow2.f32 %v361_v47 }
 0x13f   :  { %v478_v48 = vpop.eup %477 }
 0x140   :  { %v186_v49 = vadd.f32 1.0, %v478_v48 }
 0x142   :  { %481 = vrcp.f32 %v186_v49 }
 0x143   :  { %v480_v50 = vpop.eup %479 }
 0x144   :  { %v187_v51 = vadd.f32 1.0, %v480_v50 }
 0x146   :  { %483 = vrcp.f32 %v187_v51 }
 0x14c   :  { %v482_v52 = vpop.eup %481 }
 0x14d   :  { %301 = vmatmul.mubr.f32.vlgmr.msra.gmra.mrb[0].mxu1 %v482_v52 }
 0x14e   :  { %306 = vmatprep.mubr.f32.mxu1 %v602_v35 }
 0x150   :  { %v484_v53 = vpop.eup %483 }
 0x151   :  { %307 = vmatmul.mubr.f32.gmra.mrb[2].mxu1 %v484_v53 }
 0x220   :  { %v302_v61 = vpop.f32.mrb[0].mxu1 }
 0x221   :  { %v303_v62 = vadd.f32 %v302_v61, %v229_v59  ;;  %v304_v63 = vpop.f32.mrb[1].mxu1 }
 0x222   :  { %v305_v0 = vadd.f32 %v304_v63, %v233_v60 }
 0x223   :  { %v362_v1 = vmul.f32 -1.442695, %v303_v62 }
 0x224   :  { %v363_v2 = vmul.f32 -1.442695, %v305_v0  ;;  %v308_v3 = vpop.f32.mrb[2].mxu1 }
 0x225   :  { %485 = vpow2.f32 %v362_v1  ;;  %v309_v4 = vadd.f32 %v308_v3, %v229_v59  ;;  %v310_v5 = vpop.f32.mrb[3].mxu1 }
 0x226   :  { %487 = vpow2.f32 %v363_v2  ;;  %v311_v6 = vadd.f32 %v310_v5, %v233_v60 }
 0x227   :  { %v364_v7 = vmul.f32 -1.442695, %v309_v4 }
 0x228   :  { %v365_v8 = vmul.f32 -1.442695, %v311_v6 }
 0x229   :  { %489 = vpow2.f32 %v364_v7 }
 0x22a   :  { %491 = vpow2.f32 %v365_v8 }
 0x22f   :  { %v486_v9 = vpop.eup %485 }
 0x230   :  { %v488_v10 = vpop.eup %487  ;;  %v325_v11 = vadd.f32 1.0, %v486_v9 }
 0x231   :  { %v326_v12 = vadd.f32 1.0, %v488_v10 }
 0x232   :  { %493 = vrcp.f32 %v325_v11 }
 0x233   :  { %v490_v13 = vpop.eup %489  ;;  %495 = vrcp.f32 %v326_v12 }
 0x234   :  { %v492_v14 = vpop.eup %491  ;;  %v327_v15 = vadd.f32 1.0, %v490_v13 }
 0x235   :  { %v328_v16 = vadd.f32 1.0, %v492_v14 }
 0x236   :  { %497 = vrcp.f32 %v327_v15 }
 0x237   :  { %499 = vrcp.f32 %v328_v16 }
 0x23c   :  { %v494_v17 = vpop.eup %493 }
 0x23d   :  { %v496_v18 = vpop.eup %495  ;;  %337 = vst [vmem:[#allocation8] sm:$0xff] %v494_v17 }
 0x23e   :  { %338 = vst [vmem:[#allocation8 + $0x8] sm:$0xff] %v496_v18 }
 0x240   :  { %v498_v19 = vpop.eup %497 }
 0x241   :  { %v500_v20 = vpop.eup %499  ;;  %339 = vst [vmem:[#allocation8 + $0x10] sm:$0xff] %v498_v19 }
 0x242   :  { %340 = vst [vmem:[#allocation8 + $0x18] sm:$0xff] %v500_v20 }
 0x243   :  { %578 = shalt.err (!%p575_p0)
}
 0x244   :  { %s579_s12 = scalar_lea.hbm %s702_s5, 512 }
 0x245   :  { %p580_p1 = scmp.ne.s32.totalorder %s702_s5, %s579_s12  ;;  %p583_p2 = scmp.lt.u32.totalorder %s579_s12, %s702_s5 }
 0x247   :  { %p585_p3 = pnand %p583_p2, %p580_p1 }
 0x249   :  { %588 = shalt.err (!%p585_p3)
}
 0x24a   :  { %352 = dma.vmem_to_hbm [thread:$0]  %s347_s8, 512, %s702_s5, [#allocation4], %s599_s1, %s599_s1, %s600_s17  }
 0x24b   :  { %593 = dma.done.wait [#allocation4], 512  }
 0x24c   :  { %594 = vsyncadd [#allocation4], 4294966784 }
 0x24d   :  { %356 = vsyncpa [#allocation3], 1 }
 0x24e   :  { %357 = vsyncpa [#allocation6], 1 }
 0x24f   :  { %358 = vsyncpa [#allocation4], 1 }

</bundles_post_ra>
